<compile_context>
chip_gen: v7x
topology: tpu7x:2x2x1
jax: 0.10.0
libtpu: 0.0.40
codegen_flags: <defaults>
</compile_context>

<pallas_src>
import functools

import jax
import jax.numpy as jnp
from jax.experimental import pallas as pl
from jax.experimental.pallas import tpu as pltpu


def _layernorm_kernel(x_ref, gb_ref, o_ref, *, eps, inv_nm1, affine_in_io):
    # x_ref: (row_tile, features) tile of the flattened (rows, features) input.
    x = x_ref[...].astype(jnp.float32)
    mean = jnp.mean(x, axis=-1, keepdims=True)
    diff = x - mean
    # Unbiased variance (Bessel correction, N-1), like torch.std default.
    var = jnp.sum(diff * diff, axis=-1, keepdims=True) * jnp.float32(inv_nm1)
    std = jnp.sqrt(var)
    # Per-row (row_tile, 1) reciprocal on the EUP instead of a full-tile divide.
    inv = pl.reciprocal(std + jnp.float32(eps), approx=False)

    gb = gb_ref[...]          # (2, features), already in the affine dtype
    g = gb[0:1, :]
    b = gb[1:2, :]

    if affine_in_io:
        # bf16 I/O on a chip with bf16 VALU: do the wide scale/shift in bf16.
        od = o_ref.dtype
        o_ref[...] = (diff * inv).astype(od) * g + b
    else:
        o_ref[...] = (diff * inv * g + b).astype(o_ref.dtype)


def _has_bf16_valu():
    # bf16 VPU exists on v6e (Trillium) and later; v5e/v5p/v4 and older do not.
    try:
        kind = jax.devices()[0].device_kind.lower()
    except Exception:
        return False
    return any(t in kind for t in ("v6", "v7", "trillium"))


def layer_norm(x, a_2, b_2, eps=1e-7, row_tile=None):
    """x: (..., features). a_2, b_2: (features,)."""
    orig_shape = x.shape
    features = orig_shape[-1]
    x2d = x.reshape(-1, features)
    rows = x2d.shape[0]

    itemsize = jnp.dtype(x2d.dtype).itemsize
    # Sublane granule by dtype packing depth (f32: 8, bf16: 16, int8/fp8: 32).
    granule = {4: 8, 2: 16, 1: 32}.get(itemsize, 8)

    # ---- Tile selection: biggest row tile giving ~8 MiB blocks in the I/O dtype.
    if row_tile is None:
        target_block_bytes = 8 << 20
        row_tile = target_block_bytes // max(features * itemsize, 1)
    row_tile = max(granule, (row_tile // granule) * granule)
    # Don't allocate a block larger than the (granule-rounded) row count.
    rows_ceil = ((rows + granule - 1) // granule) * granule
    row_tile = max(granule, min(row_tile, rows_ceil))

    grid_rows = pl.cdiv(rows, row_tile)  # partial last block handled by Pallas

    # bf16 affine path only when I/O is bf16 and the chip has a bf16 VALU.
    affine_in_io = (x2d.dtype == jnp.bfloat16) and _has_bf16_valu()
    affine_dtype = x2d.dtype if affine_in_io else jnp.float32
    # Fused, pre-cast gamma/beta: single resident (2, features) block.
    gb = jnp.stack([a_2, b_2]).astype(affine_dtype)

    kernel = functools.partial(
        _layernorm_kernel,
        eps=float(eps),
        inv_nm1=1.0 / max(features - 1, 1),
        affine_in_io=affine_in_io,
    )

    out = pl.pallas_call(
        kernel,
        out_shape=jax.ShapeDtypeStruct((rows, features), x.dtype),
        grid_spec=pltpu.PrefetchScalarGridSpec(
            num_scalar_prefetch=0,
            grid=(grid_rows,),
            in_specs=[
                pl.BlockSpec((row_tile, features), lambda i: (i, 0)),
                # Constant block index -> stays resident, no re-DMA per step.
                pl.BlockSpec((2, features), lambda i: (0, 0)),
            ],
            out_specs=pl.BlockSpec((row_tile, features), lambda i: (i, 0)),
        ),
        compiler_params=pltpu.CompilerParams(
            # Row axis is fully parallel -> shards across the 2 TCs on v7x.
            dimension_semantics=("parallel",),
            # ~8 MiB blocks double-buffered in+out (~32 MiB) fit with headroom;
            # 48 MiB is safe on v5e/v6e (128 MiB VMEM) and v7x (64 MiB VMEM).
            vmem_limit_bytes=48 << 20,
        ),
    )(x2d, gb)

    return out.reshape(orig_shape)


if __name__ == "__main__":
    key = jax.random.PRNGKey(0)
    batch, seq, hidden = 2, 8, 32

    x = jax.random.normal(key, (batch, seq, hidden), dtype=jnp.float32)
    # Deterministic parameter init, matching nn.Parameter(torch.ones/zeros(features))
    a_2 = jnp.ones((hidden,), dtype=jnp.float32)
    b_2 = jnp.zeros((hidden,), dtype=jnp.float32)

    out = layer_norm(x, a_2, b_2, eps=1e-7)
    out = jax.block_until_ready(out)

    # Reference in plain JAX (unbiased std like torch.std default, eps added to std)
    mean = jnp.mean(x, axis=-1, keepdims=True)
    std = jnp.sqrt(jnp.sum((x - mean) ** 2, axis=-1, keepdims=True) / (hidden - 1))
    ref = a_2 * (x - mean) / (std + 1e-7) + b_2
    assert jnp.allclose(out, ref, atol=1e-5, rtol=1e-5), "mismatch vs reference"

    # Non-divisible row count exercises the partial-final-block (masked) path.
    x_odd = jax.random.normal(jax.random.PRNGKey(1), (3, 5, hidden), dtype=jnp.float32)
    out_odd = jax.block_until_ready(layer_norm(x_odd, a_2, b_2, eps=1e-7))
    mean_o = jnp.mean(x_odd, axis=-1, keepdims=True)
    std_o = jnp.sqrt(jnp.sum((x_odd - mean_o) ** 2, axis=-1, keepdims=True) / (hidden - 1))
    ref_o = a_2 * (x_odd - mean_o) / (std_o + 1e-7) + b_2
    assert jnp.allclose(out_odd, ref_o, atol=1e-5, rtol=1e-5), "mismatch (tail path)"

    print("KERNEL_OK")
</pallas_src>

<mosaic_0001>
module attributes {stable_mosaic.version = 11 : i64} {
  func.func @_layernorm_kernel(%arg0: i32, %arg1: memref<16x32xf32, #tpu.memory_space<vmem>>, %arg2: memref<2x32xf32, #tpu.memory_space<vmem>>, %arg3: memref<16x32xf32, #tpu.memory_space<vmem>>) attributes {dimension_semantics = [#tpu.dimension_semantics<parallel>], iteration_bounds = array<i64: 1>, scalar_prefetch = 0 : i64, scratch_operands = 0 : i64, tpu.core_type = #tpu.core_type<tc>, window_params = [{transform_indices = @transform_0, window_bounds = array<i64: 16, 32>}, {pipeline_mode = #tpu.pipeline_mode<synchronous>, transform_indices = @transform_1, window_bounds = array<i64: 2, 32>}, {transform_indices = @transform_2, window_bounds = array<i64: 16, 32>}]} {
    %c0 = arith.constant 0 : index
    %c0_0 = arith.constant 0 : index
    %0 = vector.load %arg1[%c0, %c0_0] : memref<16x32xf32, #tpu.memory_space<vmem>>, vector<16x32xf32>
    %cst = arith.constant dense<0.000000e+00> : vector<16xf32>
    %1 = vector.multi_reduction <add>, %0, %cst [1] : vector<16x32xf32> to vector<16xf32>
    %2 = vector.shape_cast %1 : vector<16xf32> to vector<16x1xf32>
    %cst_1 = arith.constant 3.200000e+01 : f32
    %3 = vector.broadcast %cst_1 : f32 to vector<16x1xf32>
    %4 = arith.divf %2, %3 : vector<16x1xf32>
    %5 = vector.broadcast %4 : vector<16x1xf32> to vector<16x32xf32>
    %6 = arith.subf %0, %5 : vector<16x32xf32>
    %7 = arith.mulf %6, %6 : vector<16x32xf32>
    %cst_2 = arith.constant dense<0.000000e+00> : vector<16xf32>
    %8 = vector.multi_reduction <add>, %7, %cst_2 [1] : vector<16x32xf32> to vector<16xf32>
    %9 = vector.shape_cast %8 : vector<16xf32> to vector<16x1xf32>
    %cst_3 = arith.constant 0.0322580636 : f32
    %10 = vector.broadcast %cst_3 : f32 to vector<16x1xf32>
    %11 = arith.mulf %9, %10 : vector<16x1xf32>
    %12 = math.sqrt %11 : vector<16x1xf32>
    %cst_4 = arith.constant 1.000000e-07 : f32
    %13 = vector.broadcast %cst_4 : f32 to vector<16x1xf32>
    %14 = arith.addf %12, %13 : vector<16x1xf32>
    %15 = tpu.reciprocal %14 : vector<16x1xf32> -> vector<16x1xf32>
    %c0_5 = arith.constant 0 : index
    %c0_6 = arith.constant 0 : index
    %16 = vector.load %arg2[%c0_5, %c0_6] : memref<2x32xf32, #tpu.memory_space<vmem>>, vector<2x32xf32>
    %17 = vector.extract_strided_slice %16 {offsets = [0, 0], sizes = [1, 32], strides = [1, 1]} : vector<2x32xf32> to vector<1x32xf32>
    %18 = vector.extract_strided_slice %16 {offsets = [1, 0], sizes = [1, 32], strides = [1, 1]} : vector<2x32xf32> to vector<1x32xf32>
    %19 = vector.broadcast %15 : vector<16x1xf32> to vector<16x32xf32>
    %20 = arith.mulf %6, %19 : vector<16x32xf32>
    %21 = vector.broadcast %17 : vector<1x32xf32> to vector<16x32xf32>
    %22 = arith.mulf %20, %21 : vector<16x32xf32>
    %23 = vector.broadcast %18 : vector<1x32xf32> to vector<16x32xf32>
    %24 = arith.addf %22, %23 : vector<16x32xf32>
    %c0_7 = arith.constant 0 : index
    %c0_8 = arith.constant 0 : index
    %25 = vector.load %arg3[%c0_7, %c0_8] : memref<16x32xf32, #tpu.memory_space<vmem>>, vector<16x32xf32>
    tpu.vector_store %arg3[%c0_7, %c0_8], %24 {strides = array<i32>} : memref<16x32xf32, #tpu.memory_space<vmem>>, vector<16x32xf32>,
    return
  }
  func.func @transform_0(%arg0: i32) -> (i32, i32) {
    %c0_i32 = arith.constant 0 : i32
    %c0_i32_0 = arith.constant 0 : i32
    return %arg0, %c0_i32 : i32, i32
  }
  func.func @transform_1(%arg0: i32) -> (i32, i32) {
    %c0_i32 = arith.constant 0 : i32
    %c0_i32_0 = arith.constant 0 : i32
    %c0_i32_1 = arith.constant 0 : i32
    return %c0_i32, %c0_i32_0 : i32, i32
  }
  func.func @transform_2(%arg0: i32) -> (i32, i32) {
    %c0_i32 = arith.constant 0 : i32
    %c0_i32_0 = arith.constant 0 : i32
    return %arg0, %c0_i32 : i32, i32
  }
}

</mosaic_0001>

<bundles_post_ra>
// kernel: tpu_custom_call.1
= control target key start
LH: loop header
LB: loop body
LE: loop exit
PB: predicated region body
PF: predicated region fallthrough
CT: control target
= control target key end

     0   :  { %7 = vsyncpa [#allocation3], 0  ;;  %s220_s0 = inlined_call_operand.hbm [shape: f32[16,32], index: 0, kind: input, shape index: {}]   ;;  %s221_s1 = inlined_call_operand.vmem [shape: f32[2,32], index: 1, kind: input, shape index: {}]   ;;  %s222_s2 = inlined_call_operand.hbm [shape: f32[16,32], index: 2, kind: output, shape index: {}]  }
   0x1   :  { %8 = vsyncpa [#allocation4], 0  ;;  %s162_s9 = smov [#allocation2]   ;;  %s114_s13 = scalar_lea.hbm %s220_s0, 256 }
   0x2   :  { %s14_s10 = sshll.u32 %s162_s9, 4  ;;  %p115_p0 = scmp.ne.s32.totalorder %s220_s0, %s114_s13  ;;  %s15_s10 = int_to_ptr.vmem [resolvable:$true] %s14_s10 }
   0x3   :  { %p118_p1 = scmp.lt.u32.totalorder %s114_s13, %s220_s0 }
   0x5   :  { %p120_p2 = pnand %p118_p1, %p115_p0 }
   0x7   :  { %123 = shalt.err (!%p120_p2)
}
   0x8   :  { %s124_s18 = scalar_lea.vmem %s15_s10, 256  ;;  %p129_p4 = scmp.lt.s32.totalorder %s15_s10, %s15_s10 }
   0x9   :  { %p125_p3 = scmp.ne.s32.totalorder %s15_s10, %s124_s18  ;;  %p130_p5 = scmp.lt.s32.totalorder %s124_s18, %s124_s18 }
   0xb   :  { %p131_p6 = por %p130_p5, %p129_p4 }
   0xd   :  { %p132_p7 = pnand %p131_p6, %p125_p3 }
   0xf   :  { %135 = shalt.err (!%p132_p7)
}
  0x10   :  { %s163_s19 = smov 128   ;;  %s164_s20 = smov 8  }
  0x11   :  { %20 = dma.hbm_to_vmem [thread:$0]  %s220_s0, 256, %s15_s10, [#allocation3], %s163_s19, %s163_s19, %s164_s20  }
  0x12   :  { %158 = dma.done.wait [#allocation3], 256  }
  0x13   :  { %159 = vsyncadd [#allocation3], 4294967040  ;;  %vm28_vm0 = vcmask 261120   ;;  %v26_v0 = vld [vmem:[#allocation2] sm:$0xff]  ;;  %v27_v1 = vld [vmem:[#allocation2 + $0x8] sm:$0xff]  ;;  %v71_v24 = vlaneseq  ;;  %s165_s24 = smov [#allocation5]  }
  0x14   :  { %v29_v2 = vsel %vm28_vm0, %v26_v0, 0.0  ;;  %v32_v3 = vsel %vm28_vm0, %v27_v1, 0.0  ;;  %v68_v33 = vld [vmem:[%s221_s1] sm:$0x3]  ;;  %s90_s25 = sshll.u32 %s165_s24, 4  ;;  %s91_s25 = int_to_ptr.vmem [resolvable:$true] %s90_s25 }
  0x15   :  { %30 = vadd.xlane.f32.xlu0 %v29_v2  ;;  %v72_v30 = vshrl.u32 %v71_v24, 7  ;;  %s136_s26 = scalar_lea.vmem %s91_s25, 256  ;;  %p141_p9 = scmp.lt.s32.totalorder %s91_s25, %s91_s25 }
  0x16   :  { %p137_p8 = scmp.ne.s32.totalorder %s91_s25, %s136_s26  ;;  %p142_p10 = scmp.lt.s32.totalorder %s136_s26, %s136_s26 }
  0x17   :  { %v73_v32 = vsub.s32 0, %v72_v30  ;;  %v79_v34 = vsub.s32 1, %v72_v30 }
  0x18   :  { %p143_p11 = por %p142_p10, %p141_p9 }
  0x19   :  { %33 = vadd.xlane.f32.xlu0 %v32_v3  ;;  %v74_v35 = vrot.slane %v68_v33, %v73_v32  ;;  %v80_v38 = vrot.slane %v68_v33, %v79_v34 }
  0x1a   :  { %p144_p12 = pnand %p143_p11, %p137_p8 }
  0xa2   :  { %v31_v4 = vpop.xlane.xlu0 %30 }
  0xa3   :  { %v36_v5 = vmul.f32 0.03125, %v31_v4 }
  0xa5   :  { %v38_v6 = vsub.f32 %v26_v0, %v36_v5 }
  0xa6   :  { %v34_v7 = vpop.xlane.xlu0 %33 }
  0xa7   :  { %v37_v8 = vmul.f32 0.03125, %v34_v7  ;;  %v40_v9 = vmul.f32 %v38_v6, %v38_v6 }
  0xa9   :  { %v39_v10 = vsub.f32 %v27_v1, %v37_v8  ;;  %v42_v11 = vsel %vm28_vm0, %v40_v9, 0.0 }
  0xaa   :  { %43 = vadd.xlane.f32.xlu1 %v42_v11 }
  0xab   :  { %v41_v12 = vmul.f32 %v39_v10, %v39_v10 }
  0xad   :  { %v45_v13 = vsel %vm28_vm0, %v41_v12, 0.0 }
  0xae   :  { %46 = vadd.xlane.f32.xlu1 %v45_v13 }
 0x137   :  { %v44_v14 = vpop.xlane.xlu1 %43 }
 0x138   :  { %v48_v15 = vmul.f32 0.032258064, %v44_v14 }
 0x13a   :  { %106 = vrsqrt.f32 %v48_v15  ;;  %vm52_vm1 = vcmp.eq.f32.partialorder %v48_v15, inf  ;;  %v55_v20 = vand.u32 2147483648, %v48_v15  ;;  %vm54_vm2 = vcmp.eq.f32.partialorder %v48_v15, 0.0 }
 0x13b   :  { %v47_v16 = vpop.xlane.xlu1 %46 }
 0x13c   :  { %v49_v17 = vmul.f32 0.032258064, %v47_v16 }
 0x13e   :  { %108 = vrsqrt.f32 %v49_v17  ;;  %vm59_vm3 = vcmp.eq.f32.partialorder %v49_v17, inf  ;;  %v62_v27 = vand.u32 2147483648, %v49_v17  ;;  %vm61_vm4 = vcmp.eq.f32.partialorder %v49_v17, 0.0 }
 0x144   :  { %v107_v18 = vpop.eup %106 }
 0x145   :  { %v51_v19 = vmul.f32 %v107_v18, %v48_v15 }
 0x147   :  { %v53_v21 = vsel %vm52_vm1, %v48_v15, %v51_v19 }
 0x148   :  { %v109_v22 = vpop.eup %108  ;;  %v56_v23 = vsel %vm54_vm2, %v55_v20, %v53_v21 }
 0x149   :  { %v64_v25 = vadd.f32 1e-07, %v56_v23  ;;  %v58_v26 = vmul.f32 %v109_v22, %v49_v17 }
 0x14b   :  { %110 = vrcp.f32 %v64_v25  ;;  %v60_v28 = vsel %vm59_vm3, %v49_v17, %v58_v26 }
 0x14c   :  { %v63_v29 = vsel %vm61_vm4, %v62_v27, %v60_v28 }
 0x14d   :  { %v65_v31 = vadd.f32 1e-07, %v63_v29 }
 0x14f   :  { %112 = vrcp.f32 %v65_v31 }
 0x155   :  { %v111_v36 = vpop.eup %110 }
 0x156   :  { %v69_v37 = vmul.f32 %v111_v36, %v38_v6 }
 0x158   :  { %v75_v39 = vmul.f32 %v74_v35, %v69_v37 }
 0x159   :  { %v113_v40 = vpop.eup %112 }
 0x15a   :  { %v70_v41 = vmul.f32 %v113_v40, %v39_v10  ;;  %v81_v42 = vadd.f32 %v80_v38, %v75_v39 }
 0x15c   :  { %v76_v43 = vmul.f32 %v74_v35, %v70_v41  ;;  %83 = vst.msk [vmem:[#allocation5] sm:$0xff] %vm28_vm0, %v81_v42 }
 0x15e   :  { %v82_v44 = vadd.f32 %v80_v38, %v76_v43 }
 0x160   :  { %84 = vst.msk [vmem:[#allocation5 + $0x8] sm:$0xff] %vm28_vm0, %v82_v44 }
 0x161   :  { %147 = shalt.err (!%p144_p12)
}
 0x162   :  { %s148_s28 = scalar_lea.hbm %s222_s2, 256 }
 0x163   :  { %p149_p13 = scmp.ne.s32.totalorder %s222_s2, %s148_s28  ;;  %p152_p0 = scmp.lt.u32.totalorder %s148_s28, %s222_s2 }
 0x165   :  { %p154_p1 = pnand %p152_p0, %p149_p13 }
 0x167   :  { %157 = shalt.err (!%p154_p1)
}
 0x168   :  { %96 = dma.vmem_to_hbm [thread:$0]  %s91_s25, 256, %s222_s2, [#allocation4], %s163_s19, %s163_s19, %s164_s20  }
 0x169   :  { %160 = dma.done.wait [#allocation4], 256  }
 0x16a   :  { %161 = vsyncadd [#allocation4], 4294967040 }
 0x16b   :  { %100 = vsyncpa [#allocation3], 1 }
 0x16c   :  { %101 = vsyncpa [#allocation4], 1 }

</bundles_post_ra>
